<compile_context>
chip_gen: v6e
topology: v6e:2x2x1
jax: 0.10.0
libtpu: 0.0.40
codegen_flags: <defaults>
</compile_context>

<pallas_src>
from functools import partial

import jax
import jax.numpy as jnp
from jax.experimental import pallas as pl
from jax.experimental.pallas import tpu as pltpu

IN_F = 64      # dense1 in_features
HID = 32       # dense1 out_features
OUT = 10       # dense2 out_features
HID_PAD = 128  # lane-dense hidden width (zero-padded)


def mlp_kernel(x_ref, w1_ref, b1_ref, w2_ref, b2_ref, o_ref):
    # x: (bm, 64) f32, w1: (64, 128) bf16, b1: (1, 128) f32,
    # w2: (128, 10) bf16, b2: (1, 10) f32, o: (bm, 10) f32
    # Cast x to bf16 in-kernel (VPU cast is free filler; saves an HBM pass).
    x = x_ref[...].astype(jnp.bfloat16)

    # dense1 + ReLU (bf16 MXU inputs, f32 accumulation, f32 elementwise).
    h = jnp.dot(x, w1_ref[...], preferred_element_type=jnp.float32)
    h = jnp.maximum(h + b1_ref[...], 0.0)

    # dense2: (bm, 128) @ (128, 10) -> (bm, 10), f32 accumulation.
    y = jnp.dot(h.astype(jnp.bfloat16), w2_ref[...],
                preferred_element_type=jnp.float32)
    o_ref[...] = y + b2_ref[...]


def _round_up(n, m):
    return pl.cdiv(n, m) * m


def prepare_params(w1, b1, w2, b2):
    """One-time weight prep (hoisted out of the per-call hot path).

    w1: (64, 32), b1: (1, 32), w2: (32, 10), b2: (1, 10); weights stored
    (in, out), i.e. transposed vs. PyTorch's (out, in). Hidden dim is
    zero-padded 32 -> 128 so the hidden activations are lane-dense; padded
    K rows of w2 are zero, so the math is unchanged.
    """
    w1p = jnp.zeros((IN_F, HID_PAD), jnp.bfloat16).at[:, :HID].set(
        w1.astype(jnp.bfloat16))
    b1p = jnp.zeros((1, HID_PAD), jnp.float32).at[:, :HID].set(
        b1.reshape(1, HID).astype(jnp.float32))
    w2p = jnp.zeros((HID_PAD, OUT), jnp.bfloat16).at[:HID, :].set(
        w2.astype(jnp.bfloat16))
    b2p = b2.reshape(1, OUT).astype(jnp.float32)
    return w1p, b1p, w2p, b2p


@partial(jax.jit, static_argnames=("block_batch",))
def small_fashion_prediction(x, w1p, b1p, w2p, b2p, *, block_batch=8192):
    """x: (B, 64) float32; padded params from prepare_params().

    Returns (B, 10) float32 = ReLU(x @ w1 + b1) @ w2 + b2 (bf16 MXU inputs,
    f32 accumulation).
    """
    B = x.shape[0]

    # Big row blocks amortize the ~0.35 us per-grid-step overhead; small B
    # just rounds up to the 8-row sublane granularity.
    bm = min(block_batch, _round_up(B, 8))
    grid = (pl.cdiv(B, bm),)

    return pl.pallas_call(
        mlp_kernel,
        out_shape=jax.ShapeDtypeStruct((B, OUT), jnp.float32),
        grid=grid,
        in_specs=[
            pl.BlockSpec((bm, IN_F), lambda i: (i, 0)),         # x: tiled rows
            pl.BlockSpec((IN_F, HID_PAD), lambda i: (0, 0)),    # w1: resident
            pl.BlockSpec((1, HID_PAD), lambda i: (0, 0)),       # b1: resident
            pl.BlockSpec((HID_PAD, OUT), lambda i: (0, 0)),     # w2: resident
            pl.BlockSpec((1, OUT), lambda i: (0, 0)),           # b2: resident
        ],
        out_specs=pl.BlockSpec((bm, OUT), lambda i: (i, 0)),    # narrow output
        compiler_params=pltpu.CompilerParams(
            dimension_semantics=("parallel",),   # megacore sharding
            vmem_limit_bytes=32 * 1024 * 1024),  # headroom over v5e default
    )(x, w1p, b1p, w2p, b2p)


def init_params(key):
    """Deterministic init mimicking nn.Linear's uniform(-1/sqrt(fan_in), ...)."""
    k1, k2, k3, k4 = jax.random.split(key, 4)

    lim1 = 1.0 / jnp.sqrt(float(IN_F))
    w1 = jax.random.uniform(k1, (IN_F, HID), jnp.float32, -lim1, lim1)
    b1 = jax.random.uniform(k2, (1, HID), jnp.float32, -lim1, lim1)

    lim2 = 1.0 / jnp.sqrt(float(HID))
    w2 = jax.random.uniform(k3, (HID, OUT), jnp.float32, -lim2, lim2)
    b2 = jax.random.uniform(k4, (1, OUT), jnp.float32, -lim2, lim2)

    return w1, b1, w2, b2


def ref_forward(x, w1, b1, w2, b2):
    """Reference emulating the kernel's bf16 MXU inputs with f32 accumulation."""
    f32 = jnp.float32
    xb = x.astype(jnp.bfloat16).astype(f32)
    w1b = w1.astype(jnp.bfloat16).astype(f32)
    w2b = w2.astype(jnp.bfloat16).astype(f32)
    h = jnp.maximum(xb @ w1b + b1, 0.0)
    hb = h.astype(jnp.bfloat16).astype(f32)
    return hb @ w2b + b2


if __name__ == "__main__":
    key = jax.random.PRNGKey(0)
    k_x, k_x2, k_p = jax.random.split(key, 3)
    w1, b1, w2, b2 = init_params(k_p)
    w1p, b1p, w2p, b2p = prepare_params(w1, b1, w2, b2)  # padded once, cached

    # Small batch (single grid step).
    B = 8
    x = jax.random.normal(k_x, (B, IN_F), jnp.float32)
    out = jax.block_until_ready(
        small_fashion_prediction(x, w1p, b1p, w2p, b2p))
    ref = ref_forward(x, w1, b1, w2, b2)
    assert out.shape == (B, OUT)
    assert jnp.allclose(out, ref, atol=5e-3, rtol=5e-3)

    # Non-multiple-of-8 batch exercising the masked partial last block.
    B2 = 37
    x2 = jax.random.normal(k_x2, (B2, IN_F), jnp.float32)
    out2 = jax.block_until_ready(
        small_fashion_prediction(x2, w1p, b1p, w2p, b2p))
    ref2 = ref_forward(x2, w1, b1, w2, b2)
    assert out2.shape == (B2, OUT)
    assert jnp.allclose(out2, ref2, atol=5e-3, rtol=5e-3)

    print("KERNEL_OK")
</pallas_src>

<mosaic_0001>
module attributes {stable_mosaic.version = 11 : i64} {
  func.func @mlp_kernel(%arg0: i32, %arg1: memref<8x64xf32, #tpu.memory_space<vmem>>, %arg2: memref<64x128xbf16, #tpu.memory_space<vmem>>, %arg3: memref<1x128xf32, #tpu.memory_space<vmem>>, %arg4: memref<128x10xbf16, #tpu.memory_space<vmem>>, %arg5: memref<1x10xf32, #tpu.memory_space<vmem>>, %arg6: memref<8x10xf32, #tpu.memory_space<vmem>>) attributes {dimension_semantics = [#tpu.dimension_semantics<parallel>], iteration_bounds = array<i64: 1>, scalar_prefetch = 0 : i64, scratch_operands = 0 : i64, tpu.core_type = #tpu.core_type<tc>, window_params = [{transform_indices = @transform_0, window_bounds = array<i64: 8, 64>}, {pipeline_mode = #tpu.pipeline_mode<synchronous>, transform_indices = @transform_1, window_bounds = array<i64: 64, 128>}, {pipeline_mode = #tpu.pipeline_mode<synchronous>, transform_indices = @transform_2, window_bounds = array<i64: 1, 128>}, {pipeline_mode = #tpu.pipeline_mode<synchronous>, transform_indices = @transform_3, window_bounds = array<i64: 128, 10>}, {pipeline_mode = #tpu.pipeline_mode<synchronous>, transform_indices = @transform_4, window_bounds = array<i64: 1, 10>}, {transform_indices = @transform_5, window_bounds = array<i64: 8, 10>}]} {
    %c0 = arith.constant 0 : index
    %c0_0 = arith.constant 0 : index
    %0 = vector.load %arg1[%c0, %c0_0] : memref<8x64xf32, #tpu.memory_space<vmem>>, vector<8x64xf32>
    %1 = arith.truncf %0 : vector<8x64xf32> to vector<8x64xbf16>
    %c0_1 = arith.constant 0 : index
    %c0_2 = arith.constant 0 : index
    %2 = vector.load %arg2[%c0_1, %c0_2] : memref<64x128xbf16, #tpu.memory_space<vmem>>, vector<64x128xbf16>
    %cst = arith.constant dense<0.000000e+00> : vector<8x128xf32>
    %3 = tpu.matmul %1, %2, %cst {dimension_numbers = #tpu.dot_dimension_numbers<[1], [0], [0], [1], [0, 0, 1, 1], [], []>} : vector<8x64xbf16>, vector<64x128xbf16>, vector<8x128xf32> -> vector<8x128xf32>
    %c0_3 = arith.constant 0 : index
    %c0_4 = arith.constant 0 : index
    %4 = vector.load %arg3[%c0_3, %c0_4] : memref<1x128xf32, #tpu.memory_space<vmem>>, vector<1x128xf32>
    %5 = vector.broadcast %4 : vector<1x128xf32> to vector<8x128xf32>
    %6 = arith.addf %3, %5 : vector<8x128xf32>
    %cst_5 = arith.constant 0.000000e+00 : f32
    %7 = vector.broadcast %cst_5 : f32 to vector<8x128xf32>
    %8 = arith.maximumf %6, %7 : vector<8x128xf32>
    %9 = arith.truncf %8 : vector<8x128xf32> to vector<8x128xbf16>
    %c0_6 = arith.constant 0 : index
    %c0_7 = arith.constant 0 : index
    %10 = vector.load %arg4[%c0_6, %c0_7] : memref<128x10xbf16, #tpu.memory_space<vmem>>, vector<128x10xbf16>
    %cst_8 = arith.constant dense<0.000000e+00> : vector<8x10xf32>
    %11 = tpu.matmul %9, %10, %cst_8 {dimension_numbers = #tpu.dot_dimension_numbers<[1], [0], [0], [1], [0, 0, 1, 1], [], []>} : vector<8x128xbf16>, vector<128x10xbf16>, vector<8x10xf32> -> vector<8x10xf32>
    %c0_9 = arith.constant 0 : index
    %c0_10 = arith.constant 0 : index
    %12 = vector.load %arg5[%c0_9, %c0_10] : memref<1x10xf32, #tpu.memory_space<vmem>>, vector<1x10xf32>
    %13 = vector.broadcast %12 : vector<1x10xf32> to vector<8x10xf32>
    %14 = arith.addf %11, %13 : vector<8x10xf32>
    %c0_11 = arith.constant 0 : index
    %c0_12 = arith.constant 0 : index
    %15 = vector.load %arg6[%c0_11, %c0_12] : memref<8x10xf32, #tpu.memory_space<vmem>>, vector<8x10xf32>
    tpu.vector_store %arg6[%c0_11, %c0_12], %14 {strides = array<i32>} : memref<8x10xf32, #tpu.memory_space<vmem>>, vector<8x10xf32>,
    return
  }
  func.func @transform_0(%arg0: i32) -> (i32, i32) {
    %c0_i32 = arith.constant 0 : i32
    %c0_i32_0 = arith.constant 0 : i32
    return %arg0, %c0_i32 : i32, i32
  }
  func.func @transform_1(%arg0: i32) -> (i32, i32) {
    %c0_i32 = arith.constant 0 : i32
    %c0_i32_0 = arith.constant 0 : i32
    %c0_i32_1 = arith.constant 0 : i32
    return %c0_i32, %c0_i32_0 : i32, i32
  }
  func.func @transform_2(%arg0: i32) -> (i32, i32) {
    %c0_i32 = arith.constant 0 : i32
    %c0_i32_0 = arith.constant 0 : i32
    %c0_i32_1 = arith.constant 0 : i32
    return %c0_i32, %c0_i32_0 : i32, i32
  }
  func.func @transform_3(%arg0: i32) -> (i32, i32) {
    %c0_i32 = arith.constant 0 : i32
    %c0_i32_0 = arith.constant 0 : i32
    %c0_i32_1 = arith.constant 0 : i32
    return %c0_i32, %c0_i32_0 : i32, i32
  }
  func.func @transform_4(%arg0: i32) -> (i32, i32) {
    %c0_i32 = arith.constant 0 : i32
    %c0_i32_0 = arith.constant 0 : i32
    %c0_i32_1 = arith.constant 0 : i32
    return %c0_i32, %c0_i32_0 : i32, i32
  }
  func.func @transform_5(%arg0: i32) -> (i32, i32) {
    %c0_i32 = arith.constant 0 : i32
    %c0_i32_0 = arith.constant 0 : i32
    return %arg0, %c0_i32 : i32, i32
  }
}

</mosaic_0001>

<bundles_post_ra>
// kernel: small_fashion_prediction.1
= control target key start
LH: loop header
LB: loop body
LE: loop exit
PB: predicated region body
PF: predicated region fallthrough
CT: control target
= control target key end

     0   :  { %v334_v1 = vmov 0.0   ;;  %vm335_vm0 = vmmov 0   ;;  %s415_s0 = inlined_call_operand.vmem [shape: f32[8,64], index: 0, kind: input, shape index: {}]   ;;  %s416_s1 = inlined_call_operand.vmem [shape: bf16[64,128], index: 1, kind: input, shape index: {}]   ;;  %s417_s2 = inlined_call_operand.vmem [shape: f32[1,128], index: 2, kind: input, shape index: {}]   ;;  %s418_s3 = inlined_call_operand.vmem [shape: bf16[128,10], index: 3, kind: input, shape index: {}]   ;;  %s419_s4 = inlined_call_operand.vmem [shape: f32[1,10], index: 4, kind: input, shape index: {}]   ;;  %s420_s5 = inlined_call_operand.hbm [shape: f32[8,10], index: 5, kind: output, shape index: {}]  }
   0x1   :  { %v300_v0 = vld [vmem:[%s416_s1 + $0x18] sm:$0xff]   ;;  %265 = vmatprep.subr.bf16.mxu0 %v334_v1  ;;  %277 = vmatprep.subr.bf16.mxu1 %v334_v1  ;;  %v301_v2 = vld [vmem:[%s416_s1 + $0x10] sm:$0xff]   ;;  %v302_v4 = vld [vmem:[%s416_s1 + $0x8] sm:$0xff]  }
   0x2   :  { %266 = vmatpush3.bf16.msra.mxu0 %v300_v0  ;;  %273 = vmatprep.mubr.msk.bf16.mxu0 %vm335_vm0, %v334_v1  ;;  %v304_v3 = vld [vmem:[%s418_s3 + $0x38] sm:$0xff]   ;;  %v305_v5 = vld [vmem:[%s418_s3 + $0x30] sm:$0xff]   ;;  %v303_v6 = vld [vmem:[%s416_s1] sm:$0xff]  }
   0x3   :  { %267 = vmatprep.subr.bf16.mxu0 %v334_v1  ;;  %293 = vmatprep.mubr.msk.bf16.mxu1 %vm335_vm0, %v334_v1  ;;  %v22_v7 = vld [vmem:[%s415_s0] sm:$0xff]  ;;  %v306_v8 = vld [vmem:[%s418_s3 + $0x28] sm:$0xff]  }
   0x4   :  { %278 = vmatpush3.bf16.msra.mxu1 %v304_v3 }
   0x5   :  { %279 = vmatprep.subr.bf16.mxu1 %v334_v1 }
   0x6   :  { %268 = vmatpush3.bf16.msra.mxu0 %v301_v2 }
   0x7   :  { %269 = vmatprep.subr.bf16.mxu0 %v334_v1 }
   0x8   :  { %280 = vmatpush3.bf16.msra.mxu1 %v305_v5 }
   0x9   :  { %281 = vmatprep.subr.bf16.mxu1 %v334_v1 }
   0xa   :  { %270 = vmatpush3.bf16.msra.mxu0 %v302_v4 }
   0xb   :  { %271 = vmatprep.subr.bf16.mxu0 %v334_v1 }
   0xc   :  { %10 = vsyncpa [#allocation3], 0  ;;  %v23_v9 = vpack.c.bf16 %v22_v7, %v22_v7  ;;  %vm63_vm1 = vcmask 523264   ;;  %282 = vmatpush3.bf16.msra.mxu1 %v306_v8  ;;  %v307_v10 = vld [vmem:[%s418_s3 + $0x20] sm:$0xff]   ;;  %v308_v11 = vld [vmem:[%s418_s3 + $0x18] sm:$0xff]   ;;  %s336_s21 = smov [#allocation2]  }
   0xd   :  { %283 = vmatprep.subr.bf16.mxu1 %v334_v1  ;;  %v309_v12 = vld [vmem:[%s418_s3 + $0x10] sm:$0xff]   ;;  %v310_v13 = vld [vmem:[%s418_s3 + $0x8] sm:$0xff]   ;;  %v311_v14 = vld [vmem:[%s418_s3] sm:$0xff]   ;;  %s228_s22 = sshll.u32 %s336_s21, 4  ;;  %vm220_vm2 = vcmask 80896   ;;  %s229_s22 = int_to_ptr.vmem [resolvable:$true] %s228_s22 }
   0xe   :  { %272 = vmatpush3.bf16.msra.mxu0 %v303_v6  ;;  %v236_v15 = vld [vmem:[%s417_s2] ss:$0 sm:$0xff]  ;;  %s312_s2 = scalar_lea.vmem %s229_s22, 128  ;;  %p317_p1 = scmp.lt.s32.totalorder %s229_s22, %s229_s22 }
   0xf   :  { %v242_v23 = vld [vmem:[%s419_s4] ss:$0 sm:$0xff]  ;;  %p313_p0 = scmp.ne.s32.totalorder %s229_s22, %s312_s2  ;;  %p318_p2 = scmp.lt.s32.totalorder %s312_s2, %s312_s2 }
  0x10   :  { %284 = vmatpush3.bf16.msra.mxu1 %v307_v10 }
  0x11   :  { %274 = vmatmul.mubr.msk.bf16.vlgmr.msra.gmra.mxu0 %vm63_vm1, %v23_v9  ;;  %285 = vmatprep.subr.bf16.mxu1 %v334_v1  ;;  %p319_p3 = por %p318_p2, %p317_p1 }
  0x13   :  { %p320_p4 = pnand %p319_p3, %p313_p0 }
  0x14   :  { %286 = vmatpush3.bf16.msra.mxu1 %v308_v11 }
  0x15   :  { %287 = vmatprep.subr.bf16.mxu1 %v334_v1 }
  0x18   :  { %288 = vmatpush3.bf16.msra.mxu1 %v309_v12 }
  0x19   :  { %289 = vmatprep.subr.bf16.mxu1 %v334_v1 }
  0x1c   :  { %290 = vmatpush3.bf16.msra.mxu1 %v310_v13 }
  0x1d   :  { %291 = vmatprep.subr.bf16.mxu1 %v334_v1 }
  0x20   :  { %292 = vmatpush3.bf16.msra.mxu1 %v311_v14 }
  0xd1   :  { %v101_v16 = vpop.f32.mrf.mxu0 }
  0xd2   :  { %v102_v17 = vadd.f32 %v236_v15, %v101_v16 }
  0xd3   :  { %v275_v18 = vpop.f32.mrf.mxu0 }
  0xd4   :  { %v107_v19 = vmax.f32 %v102_v17, 0.0 }
  0xd5   :  { %v104_v20 = vpop.f32.mrf.mxu0 }
  0xd6   :  { %v108_v21 = vpack.c.bf16 %v107_v19, %v107_v19 }
  0xd7   :  { %v276_v22 = vpop.f32.mrf.mxu0 }
  0xd8   :  { %294 = vmatmul.mubr.bf16.vlgmr.msra.gmra.mxu1 %v108_v21 }
 0x198   :  { %v214_v24 = vpop.f32.mrf.mxu1 }
 0x199   :  { %v215_v25 = vadd.f32 %v242_v23, %v214_v24 }
 0x19a   :  { %v295_v26 = vpop.f32.mrf.mxu1 }
 0x19b   :  { %221 = vst.msk [vmem:[#allocation2] sm:$0xff] %vm220_vm2, %v215_v25 }
 0x19c   :  { %v217_v27 = vpop.f32.mrf.mxu1 }
 0x19d   :  { %323 = shalt.err (!%p320_p4)
}
 0x19e   :  { %231 = dma.vmem_to_hbm [thread:$0]  %s229_s22, 128, %s420_s5, [#allocation3]   ;;  %v296_v28 = vpop.f32.mrf.mxu1 }
 0x19f   :  { %332 = dma.done.wait [#allocation3], 128  }
 0x1a0   :  { %333 = vsyncadd [#allocation3], 4294967168 }
 0x1a1   :  { %235 = vsyncpa [#allocation3], 1 }

</bundles_post_ra>
